<compile_context>
chip_gen: v7x
topology: tpu7x:2x2x1
jax: 0.10.0
libtpu: 0.0.40
codegen_flags: <defaults>
</compile_context>

<pallas_src>
import functools

import jax
import jax.numpy as jnp
from jax import lax
from jax.experimental import pallas as pl
from jax.experimental.pallas import tpu as pltpu


def _aspp_kernel(x_ref, w_ref, b_ref, o_ref, *, K, dil, Wp, L, Cout):
    """One batch element.

    x_ref: (1, Cin, Lin)    zero-padded input, flattened row-major (Hp*Wp)
                            with tail slack so every tap window is in bounds.
    w_ref: (K*K, Cout, Cin) BN-folded weights, tap-major (kh*K + kw).
    b_ref: (Cout, 1)        BN-folded bias.
    o_ref: (1, Cout, L)     output in padded-width layout (L = Ho*Wp).
    """
    # Folded BN bias as the accumulator's initial value.
    acc = jnp.broadcast_to(b_ref[...], (Cout, L)).astype(jnp.float32)
    # Dilated conv: each tap is a (Cout,Cin) x (Cin,L) matmul against a
    # contiguous lane-offset window of the flattened input -- no reshapes,
    # transposes or rolls inside the kernel.
    for kh in range(K):
        for kw in range(K):
            s = kh * dil * Wp + kw * dil                   # static offset
            rhs = x_ref[0, :, pl.ds(s, L)]                 # (Cin, L)
            acc = acc + jnp.dot(w_ref[kh * K + kw], rhs,
                                preferred_element_type=jnp.float32)
    # ReLU epilogue.
    o_ref[0] = jnp.maximum(acc, 0.0).astype(o_ref.dtype)


def aspp_module_forward(x_nchw, weight, gamma, beta, run_mean, run_var,
                        *, padding, dilation, eps=1e-5, compute_dtype=None):
    """x_nchw: (N, Cin, H, W); weight: (Cout, Cin, K, K) (PyTorch OIHW layout)."""
    N, Cin, H, W = x_nchw.shape
    Cout, _, K, _ = weight.shape
    d, p = dilation, padding

    Ho = H + 2 * p - d * (K - 1)
    Wo = W + 2 * p - d * (K - 1)
    Hp = H + 2 * p
    Wp = W + 2 * p
    L = Ho * Wp                      # per-image output length (padded width)

    # ---- fold eval-mode BatchNorm into the conv (wrapper-side, tiny) ----
    scale = gamma.astype(jnp.float32) * lax.rsqrt(run_var.astype(jnp.float32) + eps)
    w_folded = weight.astype(jnp.float32) * scale[:, None, None, None]
    bias = beta.astype(jnp.float32) - run_mean.astype(jnp.float32) * scale
    # (Cout, Cin, K, K) -> (K*K, Cout, Cin), tap-major (kh*K + kw).
    w_taps = jnp.transpose(w_folded, (2, 3, 0, 1)).reshape(K * K, Cout, Cin)
    b2 = bias.reshape(Cout, 1)

    # ---- input glue: one pad (+ slack rows so every flattened tap window is
    # in bounds), free flatten, no transpose ----
    max_off = (K - 1) * d * Wp + (K - 1) * d
    slack_rows = max(pl.cdiv(max_off + L - Hp * Wp, Wp), 0)
    x_pad = jnp.pad(x_nchw, ((0, 0), (0, 0), (p, p + slack_rows), (p, p)))
    Lin = (Hp + slack_rows) * Wp
    x_flat = x_pad.reshape(N, Cin, Lin)

    if compute_dtype is not None:      # e.g. jnp.bfloat16 on v6e/v7x
        x_flat = x_flat.astype(compute_dtype)
        w_taps = w_taps.astype(compute_dtype)

    kernel = functools.partial(_aspp_kernel, K=K, dil=d, Wp=Wp, L=L, Cout=Cout)

    out_flat = pl.pallas_call(
        kernel,
        out_shape=jax.ShapeDtypeStruct((N, Cout, L), x_nchw.dtype),
        grid_spec=pltpu.PrefetchScalarGridSpec(
            num_scalar_prefetch=0,
            grid=(N,),
            in_specs=[
                pl.BlockSpec((1, Cin, Lin), lambda n: (n, 0, 0)),
                pl.BlockSpec((K * K, Cout, Cin), lambda n: (0, 0, 0)),
                pl.BlockSpec((Cout, 1), lambda n: (0, 0)),
            ],
            out_specs=pl.BlockSpec((1, Cout, L), lambda n: (n, 0, 0)),
        ),
        compiler_params=pltpu.CompilerParams(
            dimension_semantics=("parallel",)),
    )(x_flat, w_taps, b2)

    # Padded-width layout -> NCHW: free reshape + one cheap slice, no transpose.
    out = out_flat.reshape(N, Cout, Ho, Wp)[:, :, :, :Wo]
    return out


def _reference(x_nchw, weight, gamma, beta, run_mean, run_var,
               *, padding, dilation, eps=1e-5):
    conv = lax.conv_general_dilated(
        x_nchw.astype(jnp.float32), weight.astype(jnp.float32),
        window_strides=(1, 1),
        padding=((padding, padding), (padding, padding)),
        rhs_dilation=(dilation, dilation),
        dimension_numbers=("NCHW", "OIHW", "NCHW"))
    scale = (gamma * lax.rsqrt(run_var + eps))[None, :, None, None]
    shift = (beta - run_mean * gamma * lax.rsqrt(run_var + eps))[None, :, None, None]
    return jnp.maximum(conv * scale + shift, 0.0)


if __name__ == "__main__":
    # Module config: _ASPPModule(inplanes=4, planes=8, kernel_size=3,
    #                            padding=2, dilation=2, BatchNorm)
    N, Cin, H, W = 2, 4, 16, 16
    Cout, K, pad, dil = 8, 3, 2, 2

    key = jax.random.PRNGKey(0)
    kx, kw = jax.random.split(key)

    x = jax.random.normal(kx, (N, Cin, H, W), dtype=jnp.float32)

    # kaiming_normal_ (fan_in, relu gain): std = sqrt(2 / (Cin*K*K))
    fan_in = Cin * K * K
    weight = jax.random.normal(kw, (Cout, Cin, K, K), dtype=jnp.float32) * jnp.sqrt(
        2.0 / fan_in)

    # BN params as initialized by _init_weight + fresh running stats.
    gamma = jnp.ones((Cout,), jnp.float32)
    beta = jnp.zeros((Cout,), jnp.float32)
    run_mean = jnp.zeros((Cout,), jnp.float32)
    run_var = jnp.ones((Cout,), jnp.float32)

    out = aspp_module_forward(x, weight, gamma, beta, run_mean, run_var,
                              padding=pad, dilation=dil)
    out = jax.block_until_ready(out)

    ref = _reference(x, weight, gamma, beta, run_mean, run_var,
                     padding=pad, dilation=dil)
    assert out.shape == (N, Cout, H, W), out.shape
    assert jnp.allclose(out, ref, atol=1e-4, rtol=1e-4), \
        float(jnp.max(jnp.abs(out - ref)))

    print("KERNEL_OK")
</pallas_src>

<mosaic_0001>
module attributes {stable_mosaic.version = 11 : i64} {
  func.func @_aspp_kernel(%arg0: i32, %arg1: memref<1x4x420xf32, #tpu.memory_space<vmem>>, %arg2: memref<9x8x4xf32, #tpu.memory_space<vmem>>, %arg3: memref<8x1xf32, #tpu.memory_space<vmem>>, %arg4: memref<1x8x320xf32, #tpu.memory_space<vmem>>) attributes {dimension_semantics = [#tpu.dimension_semantics<parallel>], iteration_bounds = array<i64: 2>, scalar_prefetch = 0 : i64, scratch_operands = 0 : i64, tpu.core_type = #tpu.core_type<tc>, window_params = [{transform_indices = @transform_0, window_bounds = array<i64: 1, 4, 420>}, {pipeline_mode = #tpu.pipeline_mode<synchronous>, transform_indices = @transform_1, window_bounds = array<i64: 9, 8, 4>}, {pipeline_mode = #tpu.pipeline_mode<synchronous>, transform_indices = @transform_2, window_bounds = array<i64: 8, 1>}, {transform_indices = @transform_3, window_bounds = array<i64: 1, 8, 320>}]} {
    %c0 = arith.constant 0 : index
    %c0_0 = arith.constant 0 : index
    %0 = vector.load %arg3[%c0, %c0_0] : memref<8x1xf32, #tpu.memory_space<vmem>>, vector<8x1xf32>
    %1 = vector.shape_cast %0 : vector<8x1xf32> to vector<8x1xf32>
    %2 = vector.broadcast %1 : vector<8x1xf32> to vector<8x320xf32>
    %c0_1 = arith.constant 0 : index
    %c0_2 = arith.constant 0 : index
    %c0_3 = arith.constant 0 : index
    %3 = vector.load %arg1[%c0_1, %c0_2, %c0_3] : memref<1x4x420xf32, #tpu.memory_space<vmem>>, vector<1x4x320xf32>
    %4 = vector.shape_cast %3 : vector<1x4x320xf32> to vector<4x320xf32>
    %c0_4 = arith.constant 0 : index
    %c0_5 = arith.constant 0 : index
    %c0_6 = arith.constant 0 : index
    %5 = vector.load %arg2[%c0_4, %c0_5, %c0_6] : memref<9x8x4xf32, #tpu.memory_space<vmem>>, vector<1x8x4xf32>
    %6 = vector.shape_cast %5 : vector<1x8x4xf32> to vector<8x4xf32>
    %cst = arith.constant dense<0.000000e+00> : vector<8x320xf32>
    %7 = tpu.matmul %6, %4, %cst {dimension_numbers = #tpu.dot_dimension_numbers<[1], [0], [0], [1], [0, 0, 1, 1], [], []>} : vector<8x4xf32>, vector<4x320xf32>, vector<8x320xf32> -> vector<8x320xf32>
    %8 = arith.addf %2, %7 : vector<8x320xf32>
    %c0_7 = arith.constant 0 : index
    %c0_8 = arith.constant 0 : index
    %c2 = arith.constant 2 : index
    %9 = vector.load %arg1[%c0_7, %c0_8, %c2] : memref<1x4x420xf32, #tpu.memory_space<vmem>>, vector<1x4x320xf32>
    %10 = vector.shape_cast %9 : vector<1x4x320xf32> to vector<4x320xf32>
    %c1 = arith.constant 1 : index
    %c0_9 = arith.constant 0 : index
    %c0_10 = arith.constant 0 : index
    %11 = vector.load %arg2[%c1, %c0_9, %c0_10] : memref<9x8x4xf32, #tpu.memory_space<vmem>>, vector<1x8x4xf32>
    %12 = vector.shape_cast %11 : vector<1x8x4xf32> to vector<8x4xf32>
    %cst_11 = arith.constant dense<0.000000e+00> : vector<8x320xf32>
    %13 = tpu.matmul %12, %10, %cst_11 {dimension_numbers = #tpu.dot_dimension_numbers<[1], [0], [0], [1], [0, 0, 1, 1], [], []>} : vector<8x4xf32>, vector<4x320xf32>, vector<8x320xf32> -> vector<8x320xf32>
    %14 = arith.addf %8, %13 : vector<8x320xf32>
    %c0_12 = arith.constant 0 : index
    %c0_13 = arith.constant 0 : index
    %c4 = arith.constant 4 : index
    %15 = vector.load %arg1[%c0_12, %c0_13, %c4] : memref<1x4x420xf32, #tpu.memory_space<vmem>>, vector<1x4x320xf32>
    %16 = vector.shape_cast %15 : vector<1x4x320xf32> to vector<4x320xf32>
    %c2_14 = arith.constant 2 : index
    %c0_15 = arith.constant 0 : index
    %c0_16 = arith.constant 0 : index
    %17 = vector.load %arg2[%c2_14, %c0_15, %c0_16] : memref<9x8x4xf32, #tpu.memory_space<vmem>>, vector<1x8x4xf32>
    %18 = vector.shape_cast %17 : vector<1x8x4xf32> to vector<8x4xf32>
    %cst_17 = arith.constant dense<0.000000e+00> : vector<8x320xf32>
    %19 = tpu.matmul %18, %16, %cst_17 {dimension_numbers = #tpu.dot_dimension_numbers<[1], [0], [0], [1], [0, 0, 1, 1], [], []>} : vector<8x4xf32>, vector<4x320xf32>, vector<8x320xf32> -> vector<8x320xf32>
    %20 = arith.addf %14, %19 : vector<8x320xf32>
    %c0_18 = arith.constant 0 : index
    %c0_19 = arith.constant 0 : index
    %c40 = arith.constant 40 : index
    %21 = vector.load %arg1[%c0_18, %c0_19, %c40] : memref<1x4x420xf32, #tpu.memory_space<vmem>>, vector<1x4x320xf32>
    %22 = vector.shape_cast %21 : vector<1x4x320xf32> to vector<4x320xf32>
    %c3 = arith.constant 3 : index
    %c0_20 = arith.constant 0 : index
    %c0_21 = arith.constant 0 : index
    %23 = vector.load %arg2[%c3, %c0_20, %c0_21] : memref<9x8x4xf32, #tpu.memory_space<vmem>>, vector<1x8x4xf32>
    %24 = vector.shape_cast %23 : vector<1x8x4xf32> to vector<8x4xf32>
    %cst_22 = arith.constant dense<0.000000e+00> : vector<8x320xf32>
    %25 = tpu.matmul %24, %22, %cst_22 {dimension_numbers = #tpu.dot_dimension_numbers<[1], [0], [0], [1], [0, 0, 1, 1], [], []>} : vector<8x4xf32>, vector<4x320xf32>, vector<8x320xf32> -> vector<8x320xf32>
    %26 = arith.addf %20, %25 : vector<8x320xf32>
    %c0_23 = arith.constant 0 : index
    %c0_24 = arith.constant 0 : index
    %c42 = arith.constant 42 : index
    %27 = vector.load %arg1[%c0_23, %c0_24, %c42] : memref<1x4x420xf32, #tpu.memory_space<vmem>>, vector<1x4x320xf32>
    %28 = vector.shape_cast %27 : vector<1x4x320xf32> to vector<4x320xf32>
    %c4_25 = arith.constant 4 : index
    %c0_26 = arith.constant 0 : index
    %c0_27 = arith.constant 0 : index
    %29 = vector.load %arg2[%c4_25, %c0_26, %c0_27] : memref<9x8x4xf32, #tpu.memory_space<vmem>>, vector<1x8x4xf32>
    %30 = vector.shape_cast %29 : vector<1x8x4xf32> to vector<8x4xf32>
    %cst_28 = arith.constant dense<0.000000e+00> : vector<8x320xf32>
    %31 = tpu.matmul %30, %28, %cst_28 {dimension_numbers = #tpu.dot_dimension_numbers<[1], [0], [0], [1], [0, 0, 1, 1], [], []>} : vector<8x4xf32>, vector<4x320xf32>, vector<8x320xf32> -> vector<8x320xf32>
    %32 = arith.addf %26, %31 : vector<8x320xf32>
    %c0_29 = arith.constant 0 : index
    %c0_30 = arith.constant 0 : index
    %c44 = arith.constant 44 : index
    %33 = vector.load %arg1[%c0_29, %c0_30, %c44] : memref<1x4x420xf32, #tpu.memory_space<vmem>>, vector<1x4x320xf32>
    %34 = vector.shape_cast %33 : vector<1x4x320xf32> to vector<4x320xf32>
    %c5 = arith.constant 5 : index
    %c0_31 = arith.constant 0 : index
    %c0_32 = arith.constant 0 : index
    %35 = vector.load %arg2[%c5, %c0_31, %c0_32] : memref<9x8x4xf32, #tpu.memory_space<vmem>>, vector<1x8x4xf32>
    %36 = vector.shape_cast %35 : vector<1x8x4xf32> to vector<8x4xf32>
    %cst_33 = arith.constant dense<0.000000e+00> : vector<8x320xf32>
    %37 = tpu.matmul %36, %34, %cst_33 {dimension_numbers = #tpu.dot_dimension_numbers<[1], [0], [0], [1], [0, 0, 1, 1], [], []>} : vector<8x4xf32>, vector<4x320xf32>, vector<8x320xf32> -> vector<8x320xf32>
    %38 = arith.addf %32, %37 : vector<8x320xf32>
    %c0_34 = arith.constant 0 : index
    %c0_35 = arith.constant 0 : index
    %c80 = arith.constant 80 : index
    %39 = vector.load %arg1[%c0_34, %c0_35, %c80] : memref<1x4x420xf32, #tpu.memory_space<vmem>>, vector<1x4x320xf32>
    %40 = vector.shape_cast %39 : vector<1x4x320xf32> to vector<4x320xf32>
    %c6 = arith.constant 6 : index
    %c0_36 = arith.constant 0 : index
    %c0_37 = arith.constant 0 : index
    %41 = vector.load %arg2[%c6, %c0_36, %c0_37] : memref<9x8x4xf32, #tpu.memory_space<vmem>>, vector<1x8x4xf32>
    %42 = vector.shape_cast %41 : vector<1x8x4xf32> to vector<8x4xf32>
    %cst_38 = arith.constant dense<0.000000e+00> : vector<8x320xf32>
    %43 = tpu.matmul %42, %40, %cst_38 {dimension_numbers = #tpu.dot_dimension_numbers<[1], [0], [0], [1], [0, 0, 1, 1], [], []>} : vector<8x4xf32>, vector<4x320xf32>, vector<8x320xf32> -> vector<8x320xf32>
    %44 = arith.addf %38, %43 : vector<8x320xf32>
    %c0_39 = arith.constant 0 : index
    %c0_40 = arith.constant 0 : index
    %c82 = arith.constant 82 : index
    %45 = vector.load %arg1[%c0_39, %c0_40, %c82] : memref<1x4x420xf32, #tpu.memory_space<vmem>>, vector<1x4x320xf32>
    %46 = vector.shape_cast %45 : vector<1x4x320xf32> to vector<4x320xf32>
    %c7 = arith.constant 7 : index
    %c0_41 = arith.constant 0 : index
    %c0_42 = arith.constant 0 : index
    %47 = vector.load %arg2[%c7, %c0_41, %c0_42] : memref<9x8x4xf32, #tpu.memory_space<vmem>>, vector<1x8x4xf32>
    %48 = vector.shape_cast %47 : vector<1x8x4xf32> to vector<8x4xf32>
    %cst_43 = arith.constant dense<0.000000e+00> : vector<8x320xf32>
    %49 = tpu.matmul %48, %46, %cst_43 {dimension_numbers = #tpu.dot_dimension_numbers<[1], [0], [0], [1], [0, 0, 1, 1], [], []>} : vector<8x4xf32>, vector<4x320xf32>, vector<8x320xf32> -> vector<8x320xf32>
    %50 = arith.addf %44, %49 : vector<8x320xf32>
    %c0_44 = arith.constant 0 : index
    %c0_45 = arith.constant 0 : index
    %c84 = arith.constant 84 : index
    %51 = vector.load %arg1[%c0_44, %c0_45, %c84] : memref<1x4x420xf32, #tpu.memory_space<vmem>>, vector<1x4x320xf32>
    %52 = vector.shape_cast %51 : vector<1x4x320xf32> to vector<4x320xf32>
    %c8 = arith.constant 8 : index
    %c0_46 = arith.constant 0 : index
    %c0_47 = arith.constant 0 : index
    %53 = vector.load %arg2[%c8, %c0_46, %c0_47] : memref<9x8x4xf32, #tpu.memory_space<vmem>>, vector<1x8x4xf32>
    %54 = vector.shape_cast %53 : vector<1x8x4xf32> to vector<8x4xf32>
    %cst_48 = arith.constant dense<0.000000e+00> : vector<8x320xf32>
    %55 = tpu.matmul %54, %52, %cst_48 {dimension_numbers = #tpu.dot_dimension_numbers<[1], [0], [0], [1], [0, 0, 1, 1], [], []>} : vector<8x4xf32>, vector<4x320xf32>, vector<8x320xf32> -> vector<8x320xf32>
    %56 = arith.addf %50, %55 : vector<8x320xf32>
    %cst_49 = arith.constant 0.000000e+00 : f32
    %57 = vector.broadcast %cst_49 : f32 to vector<8x320xf32>
    %58 = arith.maximumf %56, %57 : vector<8x320xf32>
    %c0_50 = arith.constant 0 : index
    %c0_51 = arith.constant 0 : index
    %c0_52 = arith.constant 0 : index
    %59 = vector.load %arg4[%c0_50, %c0_51, %c0_52] : memref<1x8x320xf32, #tpu.memory_space<vmem>>, vector<1x8x320xf32>
    %60 = vector.shape_cast %59 : vector<1x8x320xf32> to vector<8x320xf32>
    %61 = vector.shape_cast %58 : vector<8x320xf32> to vector<1x8x320xf32>
    tpu.vector_store %arg4[%c0_50, %c0_51, %c0_52], %61 {strides = array<i32>} : memref<1x8x320xf32, #tpu.memory_space<vmem>>, vector<1x8x320xf32>,
    return
  }
  func.func @transform_0(%arg0: i32) -> (i32, i32, i32) {
    %c0_i32 = arith.constant 0 : i32
    %c0_i32_0 = arith.constant 0 : i32
    %c0_i32_1 = arith.constant 0 : i32
    return %arg0, %c0_i32, %c0_i32_0 : i32, i32, i32
  }
  func.func @transform_1(%arg0: i32) -> (i32, i32, i32) {
    %c0_i32 = arith.constant 0 : i32
    %c0_i32_0 = arith.constant 0 : i32
    %c0_i32_1 = arith.constant 0 : i32
    %c0_i32_2 = arith.constant 0 : i32
    return %c0_i32, %c0_i32_0, %c0_i32_1 : i32, i32, i32
  }
  func.func @transform_2(%arg0: i32) -> (i32, i32) {
    %c0_i32 = arith.constant 0 : i32
    %c0_i32_0 = arith.constant 0 : i32
    %c0_i32_1 = arith.constant 0 : i32
    return %c0_i32, %c0_i32_0 : i32, i32
  }
  func.func @transform_3(%arg0: i32) -> (i32, i32, i32) {
    %c0_i32 = arith.constant 0 : i32
    %c0_i32_0 = arith.constant 0 : i32
    %c0_i32_1 = arith.constant 0 : i32
    return %arg0, %c0_i32, %c0_i32_0 : i32, i32, i32
  }
}

</mosaic_0001>

<bundles_post_ra>
// kernel: tpu_custom_call.1
= control target key start
LH: loop header
LB: loop body
LE: loop exit
PB: predicated region body
PF: predicated region fallthrough
CT: control target
= control target key end

     0   :  { %8 = vsyncpa [#allocation3], 0  ;;  %s2321_s0 = inlined_call_operand.vmem [shape: f32[2,4,420], index: 0, kind: input, shape index: {}]   ;;  %s2322_s1 = inlined_call_operand.vmem [shape: f32[9,8,4], index: 1, kind: input, shape index: {}]   ;;  %s2323_s2 = inlined_call_operand.vmem [shape: f32[8,1], index: 2, kind: input, shape index: {}]   ;;  %s2324_s3 = inlined_call_operand.hbm [shape: f32[2,8,320], index: 3, kind: output, shape index: {}]  }
   0x1   :  { %10 = vsyncpa [#allocation3 + $0x1], 0  ;;  %s2094_s12 = smov 0   ;;  %s2096_s13 = smov 0  }
   0x2   :  { %s2098_s14 = smov 0   ;;  %s2100_s15 = smov 0  }
   0x3 LB: > { %s2115_s16 = sadd.s32 4294967295, %s2060_s15   ;;  %s1781_s17 = sadd.s32 4294967294, %s2060_s15   ;;  %s2060_s15 = sphi %s2100_s15, %s2330_s15   ;;  %s2056_s14 = sphi %s2098_s14, %s2329_s14   ;;  %s2052_s13 = sphi %s2096_s13, %s2328_s13   ;;  %s2048_s12 = sphi %s2094_s12, %s2327_s12  }
   0x4   : > { %s2119_s18 = sadd.s32 1, %s2060_s15   ;;  %s91_s19 = sadd.s32 1, %s2056_s14 }
   0x5   : > { %s88_s20 = ssub.s32 %s2060_s15, %s2119_s18  ;;  %p101_p0 = scmp.ne.s32.totalorder %s2056_s14, %s2052_s13 }
   0x6   : > { %p89_p1 = scmp.eq.s32.totalorder %s88_s20, 0  ;;  %p102_p2 = scmp.eq.s32.totalorder %s2115_s16, 1 }
   0x7   : > { %p107_p3 = scmp.ne.s32.totalorder %s2052_s13, %s2048_s12  ;;  %p108_p4 = scmp.eq.s32.totalorder %s1781_s17, 1 }
   0x8   : > { %s2130_s21 = scalar_select %p89_p1, %s2056_s14, %s91_s19  }
   0x9   : > { %p2132_p5 = por %p102_p2, %p101_p0  ;;  %p2136_p6 = por %p108_p4, %p107_p3 }
   0xa   : > { %p1784_p7 = scmp.ge.s32.totalorder %s2060_s15, 1  ;;  %p140_p8 = scmp.lt.s32.totalorder %s2060_s15, 3 }
   0xc   : > { %p141_p9 = pnand %p1784_p7, %p140_p8 }
   0xd   : > { %p164_p10 = scmp.lt.s32.totalorder (!%p141_p9), %s2115_s16, 1  ;;  %v2062_v0 = vmov (!%p141_p9), 0.0   ;;  %vm2063_vm0 = vmmov (!%p141_p9), 0   ;;  %vm185_vm1 = vcmask (!%p141_p9), 1043456   ;;  %s2064_s29 = smov (!%p141_p9), 126   ;;  %v177_v3 = vld [vmem:[%s2322_s1] sm:$0xff] (!%p141_p9) }
   0xe   : > { %144 = sbr.rel (%p141_p9) target bundleno = 437 (0x1b5), region = 32  ;;  %1862 = vmatprep.subr.mxu1 (!%p141_p9), %v2062_v0  ;;  %1864 = vmatprep.mubr.msk.f32.mxu1 (!%p141_p9), %vm2063_vm0, %v2062_v0  ;;  %vm181_vm2 = vcmask (!%p141_p9), 31744   ;;  %s2065_s5 = smov (!%p141_p9), 124   ;;  %v169_v12 = vld [vmem:[%s2323_s2] sm:$0xff] (!%p141_p9)  ;;  %v2072_v13 = vmov (!%p141_p9), 0   ;;  %vm349_vm3 = vcmask (!%p141_p9), 1031168  }
   0xf   : > { %256 = vmatprep.mubr.f32.mxu0 (!%p141_p9), %v2062_v0  ;;  %s2066_s6 = smov (!%p141_p9), 88   ;;  %s2067_s7 = smov (!%p141_p9), 86   ;;  %1994 = vset.pattern.permute.xlu1 (!%p141_p9), %v2072_v13  ;;  %v1792_v17 = vld [vmem:[%s2322_s1 + $0x8] sm:$0xff] (!%p141_p9)  ;;  %vm518_vm4 = vcmask (!%p141_p9), 1014784   ;;  %vm687_vm5 = vcmask (!%p141_p9), 719872   ;;  %v1798_v26 = vld [vmem:[%s2322_s1 + $0x10] sm:$0xff] (!%p141_p9) }
  0x10   : > { %s2068_s8 = smov (!%p141_p9), 84   ;;  %s2069_s9 = smov (!%p141_p9), 48   ;;  %1995 = vset.pattern.permute.xlu0 (!%p141_p9), %v2072_v13  ;;  %vm856_vm6 = vcmask (!%p141_p9), 703488   ;;  %v1804_v33 = vld [vmem:[%s2322_s1 + $0x18] sm:$0xff] (!%p141_p9)  ;;  %vm1025_vm7 = vcmask (!%p141_p9), 687104   ;;  %v1810_v41 = vld [vmem:[%s2322_s1 + $0x20] sm:$0xff] (!%p141_p9) }
  0x11   : > { %s2070_s10 = smov (!%p141_p9), 46   ;;  %s2071_s11 = smov (!%p141_p9), 44   ;;  %vm1197_vm8 = vcmask (!%p141_p9), 392192   ;;  %v1816_v48 = vld [vmem:[%s2322_s1 + $0x28] sm:$0xff] (!%p141_p9)  ;;  %vm1370_vm9 = vcmask (!%p141_p9), 375808   ;;  %v1822_v55 = vld [vmem:[%s2322_s1 + $0x30] sm:$0xff] (!%p141_p9) }
  0x12   : > { %vm1543_vm10 = vcmask (!%p141_p9), 359424   ;;  %v1828_v62 = vld [vmem:[%s2322_s1 + $0x38] sm:$0xff] (!%p141_p9)  ;;  %s161_s17 = sand.u32 (!%p141_p9), 1, %s2052_s13   ;;  %vm1705_vm11 = vcmask (!%p141_p9), 523264   ;;  %s1943_s20 = smul.u32 (!%p141_p9), 384, %s2115_s16 }
  0x13   : > { %s1942_s19 = smul.u32 (!%p141_p9), 24, %s161_s17  ;;  %s2073_s30 = smov (!%p141_p9), [#allocation2]  }
  0x14   : > { %s2002_s4 = sshll.u32 (!%p141_p9), %s2073_s30, 4  ;;  %s2003_s4 = int_to_ptr.vmem [resolvable:$false] %s2002_s4 }
  0x15   : > { %s165_s24 = scalar_select %p164_p10, %s2115_s16, 1 }
  0x16   : > { %s1708_s16 = scalar_lea.sflag [#allocation3], %s161_s17 }
  0x17   : > { %s1843_s25 = sshll.u32 %s165_s24, 4  ;;  %s163_s24 = scalar_lea.vmem [#allocation2], %s1942_s19 }
  0x18   : > { %s2151_s28 = scalar_lea.vmem %s2321_s0, %s1843_s25  ;;  %s1722_s25 = sshll.u32 %s163_s24, 4  ;;  %s2281_s25 = int_to_ptr.vmem [resolvable:$true] %s1722_s25 }
  0x19   : > { %v336_v1 = vld [vmem:[%s2151_s28] sm:$0xff]  ;;  %v176_v4 = vld [vmem:[%s2151_s28 + $0x8] sm:$0xf]  ;;  %p2005_p0 = scmp.lt.s32.totalorder %s2281_s25, %s2003_s4 }
  0x1a   : > { %343 = vrot.lane.b32.xlu1 %v336_v1, %s2064_s29  ;;  %v342_v2 = vcombine.high %v336_v1, %v336_v1  ;;  %1863 = vmatpush3.msk.msra.mxu1 %vm185_vm1, %v176_v4  ;;  %v337_v5 = vld [vmem:[%s2151_s28 + $0x8] sm:$0xf]  ;;  %v1834_v4 = vld [vmem:[%s2322_s1 + $0x40] sm:$0xff] }
  0x1b   : > { %1865 = vmatmul.mubr.msk.f32.vlgmr.msra.gmra.mrb[0].mxu1 %vm181_vm2, %v177_v3  ;;  %1867 = vmatprep.subr.mxu1 %v2062_v0  ;;  %v506_v6 = vld [vmem:[%s2151_s28 + $0x8] sm:$0xf] }
  0x1c   : > { %345 = vrot.lane.b32.xlu0 %v342_v2, %s2064_s29  ;;  %1787 = vmatprep.subr.msk.mxu0 %vm185_vm1, %v342_v2  ;;  %v675_v7 = vld [vmem:[%s2151_s28 + $0x8] sm:$0xf] }
  0x1d   : > { %1788 = vmatpush1.msk.msra.mxu0 %vm185_vm1, %v336_v1  ;;  %1869 = vmatprep.mubr.msk.f32.mxu1 %vm2063_vm0, %v2062_v0  ;;  %v844_v8 = vld [vmem:[%s2151_s28 + $0x8] sm:$0xf] }
  0x1e   : > { %514 = vrot.lane.b32.xlu1 %v342_v2, %s2065_s5  ;;  %1789 = vmatmul.mubr.msk.f32.vlgmr.msra.gmra.mrb[0].mxu0 %vm181_vm2, %v177_v3  ;;  %v1013_v9 = vld [vmem:[%s2151_s28 + $0x8] sm:$0xf] }
  0x1f   : > { %425 = vmatprep.mubr.f32.mxu0 %v2062_v0  ;;  %v1182_v10 = vld [vmem:[%s2151_s28 + $0x8] sm:$0xff]  ;;  %s2279_s28 = scalar_lea.hbm %s2324_s3, %s1943_s20 }
  0x20   : > { %347 = vrot.lane.b32.xlu0 %v337_v5, %s2064_s29  ;;  %v1188_v11 = vcombine.high %v1182_v10, %v1182_v10  ;;  %s1998_s29 = scalar_lea.vmem %s2281_s25, 384 }
  0x21   : > { %p1999_p11 = scmp.ne.s32.totalorder %s2281_s25, %s1998_s29 }
  0x22   : > { %512 = vrot.lane.b32.xlu1 %v336_v1, %s2065_s5 }
  0x23   : > { %p2000_p12 = pnand %p1999_p11, %p2132_p5 }
  0x24   : > { %516 = vrot.lane.b32.xlu0 %v506_v6, %s2065_s5  ;;  %s2004_s5 = scalar_lea.vmem %s2003_s4, 768 }
  0x25   : > { %p2001_p13 = pneg %p2000_p12  ;;  %p2006_p1 = scmp.lt.s32.totalorder %s2004_s5, %s1998_s29 }
  0x26   : > { %685 = vrot.lane.b32.xlu1 %v675_v7, %s2066_s6 }
  0x27   : > { %p2007_p2 = por %p2006_p1, %p2005_p0 }
  0x28   : > { %683 = vrot.lane.b32.xlu0 %v342_v2, %s2066_s6 }
  0x29   : > { %p2008_p3 = pnand %p2007_p2, %p2001_p13 }
  0x2a   : > { %852 = vrot.lane.b32.xlu1 %v342_v2, %s2067_s7 }
  0x2c   : > { %681 = vrot.lane.b32.xlu0 %v336_v1, %s2066_s6 }
  0x2e   : > { %850 = vrot.lane.b32.xlu1 %v336_v1, %s2067_s7 }
  0x30   : > { %854 = vrot.lane.b32.xlu0 %v844_v8, %s2067_s7 }
  0x32   : > { %1023 = vrot.lane.b32.xlu1 %v1013_v9, %s2068_s8 }
  0x34   : > { %1021 = vrot.lane.b32.xlu0 %v342_v2, %s2068_s8 }
  0x36   : > { %1191 = vrot.lane.b32.xlu1 %v342_v2, %s2069_s9 }
  0x38   : > { %1019 = vrot.lane.b32.xlu0 %v336_v1, %s2068_s8 }
  0x3a   : > { %1189 = vrot.lane.b32.xlu1 %v336_v1, %s2069_s9 }
  0x3c   : > { %1193 = vrot.lane.b32.xlu0 %v1182_v10, %s2069_s9 }
  0x3e   : > { %1364 = vrot.lane.b32.xlu1 %v342_v2, %s2070_s10 }
  0x40   : > { %1195 = vrot.lane.b32.xlu0 %v1188_v11, %s2069_s9 }
  0x42   : > { %1362 = vrot.lane.b32.xlu1 %v336_v1, %s2070_s10 }
  0x44   : > { %1366 = vrot.lane.b32.xlu0 %v1182_v10, %s2070_s10 }
  0x46   : > { %1537 = vrot.lane.b32.xlu1 %v342_v2, %s2071_s11 }
  0x48   : > { %1368 = vrot.lane.b32.xlu0 %v1188_v11, %s2070_s10 }
  0x4a   : > { %1535 = vrot.lane.b32.xlu1 %v336_v1, %s2071_s11 }
  0x4c   : > { %1539 = vrot.lane.b32.xlu0 %v1182_v10, %s2071_s11 }
  0x4e   : > { %172 = vperm.xlu1 %1994, %v169_v12  }
  0x50   : > { %1541 = vrot.lane.b32.xlu0 %v1188_v11, %s2071_s11 }
  0x8c   : > { %v344_v14 = vpop.permute.xlu1 %343 }
  0x8e   : > { %v346_v15 = vpop.permute.xlu0 %345 }
  0x8f   : > { %v350_v20 = vsel %vm349_vm3, %v344_v14, %v346_v15 }
  0x90   : > { %v515_v16 = vpop.permute.xlu1 %514 }
  0x92   : > { %v348_v18 = vpop.permute.xlu0 %347 }
  0x93   : > { %v351_v19 = vsel %vm349_vm3, %v346_v15, %v348_v18  ;;  %1868 = vmatpush3.msk.msra.mxu1 %vm185_vm1, %v348_v18 }
  0x94   : > { %1793 = vmatprep.subr.msk.mxu0 %vm185_vm1, %v351_v19  ;;  %1870 = vmatmul.mubr.msk.f32.vlgmr.msra.gmra.mrb[0].mxu1 %vm181_vm2, %v1792_v17  ;;  %v513_v21 = vpop.permute.xlu1 %512 }
  0x95   : > { %1794 = vmatpush1.msk.msra.mxu0 %vm185_vm1, %v350_v20  ;;  %1872 = vmatprep.subr.mxu1 %v2062_v0  ;;  %v519_v23 = vsel %vm518_vm4, %v513_v21, %v515_v16 }
  0x96   : > { %v517_v22 = vpop.permute.xlu0 %516  ;;  %1795 = vmatmul.mubr.msk.f32.vlgmr.msra.gmra.mrb[0].mxu0 %vm181_vm2, %v1792_v17  ;;  %1874 = vmatprep.mubr.msk.f32.mxu1 %vm2063_vm0, %v2062_v0 }
  0x97   : > { %v520_v24 = vsel %vm518_vm4, %v515_v16, %v517_v22  ;;  %1873 = vmatpush3.msk.msra.mxu1 %vm185_vm1, %v517_v22  ;;  %594 = vmatprep.mubr.f32.mxu0 %v2062_v0 }
  0x98   : > { %1799 = vmatprep.subr.msk.mxu0 %vm185_vm1, %v520_v24  ;;  %v686_v25 = vpop.permute.xlu1 %685  ;;  %1877 = vmatprep.subr.mxu1 %v2062_v0 }
  0x99   : > { %1800 = vmatpush1.msk.msra.mxu0 %vm185_vm1, %v519_v23 }
  0x9a   : > { %v684_v27 = vpop.permute.xlu0 %683 }
  0x9b   : > { %v689_v28 = vsel %vm687_vm5, %v684_v27, %v686_v25 }
  0x9c   : > { %1875 = vmatmul.mubr.msk.f32.vlgmr.msra.gmra.mrb[0].mxu1 %vm181_vm2, %v1798_v26  ;;  %1805 = vmatprep.subr.msk.mxu0 %vm185_vm1, %v689_v28  ;;  %v853_v29 = vpop.permute.xlu1 %852 }
  0x9d   : > { %1878 = vmatpush3.msk.msra.mxu1 %vm185_vm1, %v686_v25  ;;  %1879 = vmatprep.mubr.msk.f32.mxu1 %vm2063_vm0, %v2062_v0 }
  0x9e   : > { %1801 = vmatmul.mubr.msk.f32.vlgmr.msra.gmra.mrb[0].mxu0 %vm181_vm2, %v1798_v26  ;;  %v682_v30 = vpop.permute.xlu0 %681  ;;  %1882 = vmatprep.subr.mxu1 %v2062_v0 }
  0x9f   : > { %v688_v31 = vsel %vm687_vm5, %v682_v30, %v684_v27  ;;  %763 = vmatprep.mubr.f32.mxu0 %v2062_v0 }
  0xa0   : > { %1806 = vmatpush1.msk.msra.mxu0 %vm185_vm1, %v688_v31  ;;  %v851_v32 = vpop.permute.xlu1 %850 }
  0xa1   : > { %v857_v36 = vsel %vm856_vm6, %v851_v32, %v853_v29 }
  0xa2   : > { %v855_v34 = vpop.permute.xlu0 %854 }
  0xa3   : > { %v858_v35 = vsel %vm856_vm6, %v853_v29, %v855_v34 }
  0xa4   : > { %1880 = vmatmul.mubr.msk.f32.vlgmr.msra.gmra.mrb[0].mxu1 %vm181_vm2, %v1804_v33  ;;  %1811 = vmatprep.subr.msk.mxu0 %vm185_vm1, %v858_v35  ;;  %v1024_v37 = vpop.permute.xlu1 %1023 }
  0xa5   : > { %1883 = vmatpush3.msk.msra.mxu1 %vm185_vm1, %v855_v34  ;;  %1884 = vmatprep.mubr.msk.f32.mxu1 %vm2063_vm0, %v2062_v0 }
  0xa6   : > { %1807 = vmatmul.mubr.msk.f32.vlgmr.msra.gmra.mrb[0].mxu0 %vm181_vm2, %v1804_v33  ;;  %v1022_v38 = vpop.permute.xlu0 %1021  ;;  %1887 = vmatprep.subr.mxu1 %v2062_v0 }
  0xa7   : > { %1812 = vmatpush1.msk.msra.mxu0 %vm185_vm1, %v857_v36  ;;  %932 = vmatprep.mubr.f32.mxu0 %v2062_v0  ;;  %v1027_v39 = vsel %vm1025_vm7, %v1022_v38, %v1024_v37 }
  0xa8   : > { %1817 = vmatprep.subr.msk.mxu0 %vm185_vm1, %v1027_v39  ;;  %v1192_v40 = vpop.permute.xlu1 %1191 }
  0xaa   : > { %v1020_v42 = vpop.permute.xlu0 %1019 }
  0xab   : > { %v1026_v43 = vsel %vm1025_vm7, %v1020_v42, %v1022_v38 }
  0xac   : > { %1885 = vmatmul.mubr.msk.f32.vlgmr.msra.gmra.mrb[0].mxu1 %vm181_vm2, %v1810_v41  ;;  %v1190_v44 = vpop.permute.xlu1 %1189 }
  0xad   : > { %1888 = vmatpush3.msk.msra.mxu1 %vm185_vm1, %v1024_v37  ;;  %1889 = vmatprep.mubr.msk.f32.mxu1 %vm2063_vm0, %v2062_v0  ;;  %v1198_v51 = vsel %vm1197_vm8, %v1190_v44, %v1192_v40 }
  0xae   : > { %1813 = vmatmul.mubr.msk.f32.vlgmr.msra.gmra.mrb[0].mxu0 %vm181_vm2, %v1810_v41  ;;  %v1194_v45 = vpop.permute.xlu0 %1193  ;;  %1892 = vmatprep.subr.mxu1 %v2062_v0 }
  0xaf   : > { %1818 = vmatpush1.msk.msra.mxu0 %vm185_vm1, %v1026_v43  ;;  %v1199_v46 = vsel %vm1197_vm8, %v1192_v40, %v1194_v45  ;;  %1101 = vmatprep.mubr.f32.mxu0 %v2062_v0 }
  0xb0   : > { %1823 = vmatprep.subr.msk.mxu0 %vm185_vm1, %v1199_v46  ;;  %v1365_v47 = vpop.permute.xlu1 %1364 }
  0xb2   : > { %v1196_v49 = vpop.permute.xlu0 %1195 }
  0xb3   : > { %v1200_v50 = vsel %vm1197_vm8, %v1194_v45, %v1196_v49 }
  0xb4   : > { %1890 = vmatmul.mubr.msk.f32.vlgmr.msra.gmra.mrb[0].mxu1 %vm181_vm2, %v1816_v48  ;;  %v1363_v52 = vpop.permute.xlu1 %1362 }
  0xb5   : > { %1893 = vmatpush3.msk.msra.mxu1 %vm185_vm1, %v1200_v50  ;;  %1894 = vmatprep.mubr.msk.f32.mxu1 %vm2063_vm0, %v2062_v0  ;;  %v1371_v59 = vsel %vm1370_vm9, %v1363_v52, %v1365_v47 }
  0xb6   : > { %1819 = vmatmul.mubr.msk.f32.vlgmr.msra.gmra.mrb[0].mxu0 %vm181_vm2, %v1816_v48  ;;  %v1367_v53 = vpop.permute.xlu0 %1366  ;;  %1897 = vmatprep.subr.mxu1 %v2062_v0 }
  0xb7   : > { %1824 = vmatpush1.msk.msra.mxu0 %vm185_vm1, %v1198_v51  ;;  %v1372_v54 = vsel %vm1370_vm9, %v1365_v47, %v1367_v53  ;;  %1274 = vmatprep.mubr.f32.mxu0 %v2062_v0 }
  0xb8   : > { %1829 = vmatprep.subr.msk.mxu0 %vm185_vm1, %v1372_v54  ;;  %v1538_v58 = vpop.permute.xlu1 %1537 }
  0xba   : > { %v1369_v56 = vpop.permute.xlu0 %1368 }
  0xbb   : > { %v1373_v57 = vsel %vm1370_vm9, %v1367_v53, %v1369_v56 }
  0xbc   : > { %1895 = vmatmul.mubr.msk.f32.vlgmr.msra.gmra.mrb[0].mxu1 %vm181_vm2, %v1822_v55  ;;  %v1536_v63 = vpop.permute.xlu1 %1535 }
  0xbd   : > { %1898 = vmatpush3.msk.msra.mxu1 %vm185_vm1, %v1373_v57  ;;  %1899 = vmatprep.mubr.msk.f32.mxu1 %vm2063_vm0, %v2062_v0  ;;  %v1544_v3 = vsel %vm1543_vm10, %v1536_v63, %v1538_v58 }
  0xbe   : > { %1825 = vmatmul.mubr.msk.f32.vlgmr.msra.gmra.mrb[0].mxu0 %vm181_vm2, %v1822_v55  ;;  %v1540_v60 = vpop.permute.xlu0 %1539  ;;  %1902 = vmatprep.subr.mxu1 %v2062_v0 }
  0xbf   : > { %1830 = vmatpush1.msk.msra.mxu0 %vm185_vm1, %v1371_v59  ;;  %v1545_v61 = vsel %vm1543_vm10, %v1538_v58, %v1540_v60  ;;  %1447 = vmatprep.mubr.f32.mxu0 %v2062_v0 }
  0xc0   : > { %1835 = vmatprep.subr.msk.mxu0 %vm185_vm1, %v1545_v61 }
  0xc2   : > { %v1542_v1 = vpop.permute.xlu0 %1541 }
  0xc3   : > { %v1546_v2 = vsel %vm1543_vm10, %v1540_v60, %v1542_v1 }
  0xc4   : > { %1900 = vmatmul.mubr.msk.f32.vlgmr.msra.gmra.mrb[0].mxu1 %vm181_vm2, %v1828_v62 }
  0xc5   : > { %1903 = vmatpush3.msk.msra.mxu1 %vm185_vm1, %v1546_v2  ;;  %1904 = vmatprep.mubr.msk.f32.mxu1 %vm2063_vm0, %v2062_v0 }
  0xc6   : > { %1831 = vmatmul.mubr.msk.f32.vlgmr.msra.gmra.mrb[0].mxu0 %vm181_vm2, %v1828_v62 }
  0xc7   : > { %1836 = vmatpush1.msk.msra.mxu0 %vm185_vm1, %v1544_v3  ;;  %1620 = vmatprep.mubr.f32.mxu0 %v2062_v0 }
  0xcc   : > { %1905 = vmatmul.mubr.msk.f32.vlgmr.msra.gmra.mrb[0].mxu1 %vm181_vm2, %v1834_v4 }
  0xcd   : > { %v173_v5 = vpop.permute.xlu1 %172 }
  0xce   : > { %1837 = vmatmul.mubr.msk.f32.vlgmr.msra.gmra.mrb[0].mxu0 %vm181_vm2, %v1834_v4 }
 0x19f   : > { %v1693_v6 = vpop.f32.mrb[0].mxu1 }
 0x1a0   : > { %v1909_v7 = vadd.f32 %v1693_v6, %v173_v5  ;;  %v1906_v8 = vpop.f32.mrb[1].mxu1 }
 0x1a1   : > { %v1622_v9 = vpop.f32.mrb[0].mxu0 }
 0x1a2   : > { %v1702_v10 = vmax.f32 %v1909_v7, 0.0  ;;  %v1907_v0 = vadd.f32 %v1622_v9, %v173_v5  ;;  %v1624_v11 = vpop.f32.mrb[1].mxu0 }
 0x1a3   : > { %v1908_v12 = vadd.f32 %v1624_v11, %v173_v5 }
 0x1a4   : > { %1706 = vst.msk [vmem:[%s163_s24 + $0x10] sm:$0xff] %vm1705_vm11, %v1702_v10  ;;  %v1700_v13 = vmax.f32 %v1907_v0, 0.0 }
 0x1a5   : > { %v1701_v14 = vmax.f32 %v1908_v12, 0.0 }
 0x1a6   : > { %1703 = vst [vmem:[%s163_s24] sm:$0xff] %v1700_v13 }
 0x1a7   : > { %1704 = vst [vmem:[%s163_s24 + $0x8] sm:$0xff] %v1701_v14 }
 0x1a8   : > { %2011 = shalt.err (!%p2008_p3)
}
 0x1a9   : > { %s2012_s6 = scalar_lea.hbm %s2279_s28, 384  ;;  %s2016_s9 = scalar_lea.hbm %s2324_s3, 768 }
 0x1aa   : > { %p2013_p4 = scmp.ne.s32.totalorder %s2279_s28, %s2012_s6  ;;  %p2017_p9 = scmp.lt.u32.totalorder %s2279_s28, %s2324_s3 }
 0x1ab   : > { %p2018_p10 = scmp.lt.u32.totalorder %s2016_s9, %s2012_s6  ;;  %p2020_p12 = scmp.lt.u32.totalorder %s2012_s6, %s2279_s28 }
 0x1ac   : > { %p2014_p7 = pnand %p2013_p4, %p2132_p5 }
 0x1ad   : > { %p2019_p11 = por %p2018_p10, %p2017_p9 }
 0x1ae   : > { %p2015_p8 = pneg %p2014_p7 }
 0x1af   : > { %p2021_p13 = por %p2020_p12, %p2019_p11 }
 0x1b1   : > { %p2022_p0 = pnand %p2021_p13, %p2015_p8 }
 0x1b3   : > { %2025 = shalt.err (!%p2022_p0)
}
 0x1b4   : > { %1944 = dma.vmem_to_hbm [thread:$0]  (%p2132_p5), %s2281_s25, 384, %s2279_s28, %s1708_s16  }
 0x1b5 PF: > { %p1950_p1 = scmp.ge.s32.totalorder %s2060_s15, 2  ;;  %s1734_s17 = sand.u32 1, %s2048_s12  }
 0x1b6   : > { %s1735_s19 = scalar_lea.sflag [#allocation3], %s1734_s17 }
 0x1b7   : > { %p1947_p2 = pnand %p1950_p1, %p2136_p6 }
 0x1b9   : > { %2043 = dma.done.wait (!%p1947_p2), %s1735_s19, 384  }
 0x1ba   : > { %2045 = vsyncadd (!%p1947_p2), %s1735_s19, 4294966912  ;;  %p13_p3 = scmp.ge.s32.totalorder %s2119_s18, 4   ;;  %s2327_s12 = smov %s2052_s13 }
 0x1bb   : > { %s2328_s13 = smov %s2056_s14  ;;  %s2329_s14 = smov %s2130_s21 }
 0x1bc   : > { %s2330_s15 = smov %s2119_s18  ;;  %15 = sbr.rel (!%p13_p3) target bundleno = 3 (0x3), region = 75 }
 0x1c3   :  { %1740 = vsyncpa [#allocation3], 1 }
 0x1c4   :  { %1742 = vsyncpa [#allocation3 + $0x1], 1 }

</bundles_post_ra>
